<compile_context>
chip_gen: v6e
topology: v6e:2x2x1
jax: 0.10.0
libtpu: 0.0.40
codegen_flags: <defaults>
</compile_context>

<pallas_src>
import jax
import jax.numpy as jnp
from jax.experimental import pallas as pl
from jax.experimental.pallas import tpu as pltpu

LANE = 128   # vreg lane width
SUB = 8      # f32 sublane count


def _round_up(x, m):
    return (x + m - 1) // m * m


def _gelu_exact(x):
    # torch.nn.GELU() default = exact erf-based GELU (kept in f32).
    return 0.5 * x * (1.0 + jax.lax.erf(x * (1.0 / jnp.sqrt(2.0))))


# --------------------------------------------------------------------------
# Pallas kernel: token-0 mixing + fused reward/reasoning heads + squash
# --------------------------------------------------------------------------
def fused_reward_kernel(x0_ref, ctx_ref, w_mix_ref, b_mix_ref,
                        w1_ref, b1_ref, w2_ref, b2_ref, out_ref):
    # Synthetic-backbone mixing for the pooled token only.
    x0 = x0_ref[...]                                                   # [Bt, Hp] f32
    mix = jnp.dot(x0.astype(jnp.bfloat16), w_mix_ref[...],
                  preferred_element_type=jnp.float32)                  # MXU, f32 acc
    pooled = jnp.tanh(mix + b_mix_ref[...] + ctx_ref[...])             # [Bt, Hp] f32

    # Both heads' first layers fused into one wide matmul + one GELU pass.
    h = jnp.dot(pooled.astype(jnp.bfloat16), w1_ref[...],
                preferred_element_type=jnp.float32) + b1_ref[...]      # [Bt, N1p]
    h = _gelu_exact(h)

    # Second layers + 0.7/0.3 combine folded into one row vector:
    # VPU multiply + XLU lane reduce instead of two 1-wide matmuls.
    total = jnp.sum(h * w2_ref[...], axis=-1, keepdims=True) + b2_ref[0, 0]  # [Bt, 1]
    total = 3.0 * jnp.tanh(total * (1.0 / 3.0))

    # Lane-dense store; the wrapper slices column 0.
    out_ref[...] = jnp.broadcast_to(total, out_ref.shape).astype(out_ref.dtype)


# --------------------------------------------------------------------------
# One-time parameter packing: pad to tiles, fuse heads, fold 0.7/0.3 combine
# --------------------------------------------------------------------------
def pack_params(enc_params, head_params, hidden):
    h2, h4 = hidden // 2, hidden // 4
    n1 = h2 + h4
    h_pad = _round_up(hidden, LANE)
    n1_pad = _round_up(n1, LANE)

    w_mix = jnp.zeros((h_pad, h_pad), jnp.float32)
    w_mix = w_mix.at[:hidden, :hidden].set(enc_params["w_mix"])
    b_mix = jnp.zeros((1, h_pad), jnp.float32).at[0, :hidden].set(enc_params["b_mix"])

    w1 = jnp.zeros((h_pad, n1_pad), jnp.float32)
    w1 = w1.at[:hidden, :h2].set(head_params["w_r1"])
    w1 = w1.at[:hidden, h2:n1].set(head_params["w_s1"])
    b1 = jnp.zeros((1, n1_pad), jnp.float32)
    b1 = b1.at[0, :h2].set(head_params["b_r1"][0])
    b1 = b1.at[0, h2:n1].set(head_params["b_s1"][0])

    w2 = jnp.zeros((1, n1_pad), jnp.float32)
    w2 = w2.at[0, :h2].set(0.7 * head_params["w_r2"][:, 0])
    w2 = w2.at[0, h2:n1].set(0.3 * head_params["w_s2"][:, 0])
    b2 = (0.7 * head_params["b_r2"] + 0.3 * head_params["b_s2"]).reshape(1, 1)

    return {
        "w_mix": w_mix.astype(jnp.bfloat16),   # bf16 MXU operands (f32 accumulate)
        "b_mix": b_mix,
        "w1": w1.astype(jnp.bfloat16),
        "b1": b1,
        "w2": w2,
        "b2": b2,
    }


# --------------------------------------------------------------------------
# Pallas wrapper: batch grid, resident weights, lane-dense output
# --------------------------------------------------------------------------
def reward_from_token0_pallas(x0, ctx, packed):
    B, H = x0.shape
    w_mix, b_mix = packed["w_mix"], packed["b_mix"]
    w1, b1, w2, b2 = packed["w1"], packed["b1"], packed["w2"], packed["b2"]
    h_pad = w_mix.shape[0]
    n1_pad = w1.shape[1]

    b_tile = min(128, _round_up(B, SUB))
    b_pad = _round_up(B, b_tile)

    # Zero-pad activations to (b_pad, h_pad): unmasked, lane-dense tiles.
    x0_p = jnp.zeros((b_pad, h_pad), jnp.float32).at[:B, :H].set(x0)
    ctx_p = jnp.zeros((b_pad, h_pad), jnp.float32).at[:B, :H].set(ctx)

    act_spec = pl.BlockSpec((b_tile, h_pad), lambda i: (i, 0))

    def resident(shape):  # weights stay in VMEM across grid steps
        return pl.BlockSpec(shape, lambda i: (0, 0))

    out = pl.pallas_call(
        fused_reward_kernel,
        out_shape=jax.ShapeDtypeStruct((b_pad, LANE), jnp.float32),
        grid=(b_pad // b_tile,),
        in_specs=[
            act_spec,                                            # x0
            act_spec,                                            # ctx
            resident((h_pad, h_pad)),                            # w_mix (bf16)
            resident((1, h_pad)),                                # b_mix
            resident((h_pad, n1_pad)),                           # w1 fused (bf16)
            resident((1, n1_pad)),                               # b1 fused
            resident((1, n1_pad)),                               # w2 fused (0.7/0.3 folded)
            pl.BlockSpec(memory_space=pltpu.MemorySpace.SMEM),   # b2 fused scalar
        ],
        out_specs=pl.BlockSpec((b_tile, LANE), lambda i: (i, 0)),
        compiler_params=pltpu.CompilerParams(
            dimension_semantics=("parallel",),
            vmem_limit_bytes=32 * 1024 * 1024,   # safe on v5e/v6e/v7x
        ),
    )(x0_p, ctx_p, w_mix, b_mix, w1, b1, w2, b2)

    return out[:B, 0]  # squeeze(-1) + drop batch padding


# --------------------------------------------------------------------------
# Full forward (encoder stand-in in plain JAX, heads in Pallas), one jit
# --------------------------------------------------------------------------
def cot_aware_reward_model_forward(input_ids, attention_mask, embedding, packed):
    # TODO(synk): DeBERTa-v3 backbone replaced by deterministic synthetic encoder.
    x = embedding[input_ids]                                    # [B, S, H]
    mask = attention_mask[..., None].astype(x.dtype)            # [B, S, 1]
    ctx = (x * mask).sum(axis=1) / jnp.maximum(mask.sum(axis=1), 1.0)  # [B, H]
    x0 = x[:, 0, :]                                             # only token 0 is used
    return reward_from_token0_pallas(x0, ctx, packed)           # [B]


# --------------------------------------------------------------------------
# Pure-JAX f32 reference (original, unfused math) for correctness checking
# --------------------------------------------------------------------------
def reference_forward(input_ids, attention_mask, enc_params, head_params):
    emb = enc_params["embedding"]
    x = emb[input_ids]
    mask = attention_mask[..., None].astype(x.dtype)
    ctx = (x * mask).sum(axis=1) / jnp.maximum(mask.sum(axis=1), 1.0)
    hidden = jnp.tanh(jnp.einsum("bsh,hd->bsd", x, enc_params["w_mix"])
                      + enc_params["b_mix"] + ctx[:, None, :])
    pooled = hidden[:, 0, :]
    h1 = _gelu_exact(pooled @ head_params["w_r1"] + head_params["b_r1"])
    answer = h1 @ head_params["w_r2"] + head_params["b_r2"]
    h2 = _gelu_exact(pooled @ head_params["w_s1"] + head_params["b_s1"])
    reasoning = h2 @ head_params["w_s2"] + head_params["b_s2"]
    total = 0.7 * answer + 0.3 * reasoning
    return (3.0 * jnp.tanh(total / 3.0))[:, 0]


def init_params(key, vocab=64, hidden=32):
    h2, h4 = hidden // 2, hidden // 4
    ks = jax.random.split(key, 8)
    enc_params = {
        "embedding": 0.1 * jax.random.normal(ks[0], (vocab, hidden), jnp.float32),
        "w_mix": 0.1 * jax.random.normal(ks[1], (hidden, hidden), jnp.float32),
        "b_mix": jnp.zeros((hidden,), jnp.float32),
    }
    head_params = {
        # reward_head: Linear(H, H/2) -> GELU -> Linear(H/2, 1)
        "w_r1": 0.1 * jax.random.normal(ks[2], (hidden, h2), jnp.float32),
        "b_r1": 0.01 * jax.random.normal(ks[3], (1, h2), jnp.float32),
        "w_r2": 0.1 * jax.random.normal(ks[4], (h2, 1), jnp.float32),
        "b_r2": jnp.zeros((1, 1), jnp.float32),
        # reasoning_head: Linear(H, H/4) -> GELU -> Linear(H/4, 1)
        "w_s1": 0.1 * jax.random.normal(ks[5], (hidden, h4), jnp.float32),
        "b_s1": 0.01 * jax.random.normal(ks[6], (1, h4), jnp.float32),
        "w_s2": 0.1 * jax.random.normal(ks[7], (h4, 1), jnp.float32),
        "b_s2": jnp.zeros((1, 1), jnp.float32),
    }
    return enc_params, head_params


if __name__ == "__main__":
    B, S, H, V = 2, 8, 32, 64
    key = jax.random.PRNGKey(0)
    k_ids, k_params = jax.random.split(key)

    input_ids = jax.random.randint(k_ids, (B, S), 0, V, dtype=jnp.int32)
    attention_mask = jnp.ones((B, S), dtype=jnp.int32).at[1, 5:].set(0)  # ragged mask

    enc_params, head_params = init_params(k_params, vocab=V, hidden=H)
    packed = pack_params(enc_params, head_params, hidden=H)

    forward = jax.jit(cot_aware_reward_model_forward)
    total_reward = forward(input_ids, attention_mask, enc_params["embedding"], packed)
    total_reward = jax.block_until_ready(total_reward)

    # Correctness vs. the unfused f32 reference (bf16 MXU inputs => loose tol).
    ref = reference_forward(input_ids, attention_mask, enc_params, head_params)
    assert total_reward.shape == (B,)
    assert bool(jnp.all(jnp.abs(total_reward) <= 3.0))
    assert bool(jnp.allclose(total_reward, ref, atol=5e-2, rtol=5e-2))
    print("KERNEL_OK")
</pallas_src>

<mosaic_0001>
module attributes {stable_mosaic.version = 11 : i64} {
  func.func @fused_reward_kernel(%arg0: i32, %arg1: memref<8x128xf32, #tpu.memory_space<vmem>>, %arg2: memref<8x128xf32, #tpu.memory_space<vmem>>, %arg3: memref<128x128xbf16, #tpu.memory_space<vmem>>, %arg4: memref<1x128xf32, #tpu.memory_space<vmem>>, %arg5: memref<128x128xbf16, #tpu.memory_space<vmem>>, %arg6: memref<1x128xf32, #tpu.memory_space<vmem>>, %arg7: memref<1x128xf32, #tpu.memory_space<vmem>>, %arg8: memref<1x1xf32, #tpu.memory_space<smem>>, %arg9: memref<8x128xf32, #tpu.memory_space<vmem>>) attributes {dimension_semantics = [#tpu.dimension_semantics<parallel>], iteration_bounds = array<i64: 1>, scalar_prefetch = 0 : i64, scratch_operands = 0 : i64, tpu.core_type = #tpu.core_type<tc>, window_params = [{transform_indices = @transform_0, window_bounds = array<i64: 8, 128>}, {transform_indices = @transform_1, window_bounds = array<i64: 8, 128>}, {pipeline_mode = #tpu.pipeline_mode<synchronous>, transform_indices = @transform_2, window_bounds = array<i64: 128, 128>}, {pipeline_mode = #tpu.pipeline_mode<synchronous>, transform_indices = @transform_3, window_bounds = array<i64: 1, 128>}, {pipeline_mode = #tpu.pipeline_mode<synchronous>, transform_indices = @transform_4, window_bounds = array<i64: 128, 128>}, {pipeline_mode = #tpu.pipeline_mode<synchronous>, transform_indices = @transform_5, window_bounds = array<i64: 1, 128>}, {pipeline_mode = #tpu.pipeline_mode<synchronous>, transform_indices = @transform_6, window_bounds = array<i64: 1, 128>}, {transform_indices = @transform_7, window_bounds = array<i64: 1, 1>}, {transform_indices = @transform_8, window_bounds = array<i64: 8, 128>}]} {
    %c0 = arith.constant 0 : index
    %c0_0 = arith.constant 0 : index
    %0 = vector.load %arg1[%c0, %c0_0] : memref<8x128xf32, #tpu.memory_space<vmem>>, vector<8x128xf32>
    %1 = arith.truncf %0 : vector<8x128xf32> to vector<8x128xbf16>
    %c0_1 = arith.constant 0 : index
    %c0_2 = arith.constant 0 : index
    %2 = vector.load %arg3[%c0_1, %c0_2] : memref<128x128xbf16, #tpu.memory_space<vmem>>, vector<128x128xbf16>
    %cst = arith.constant dense<0.000000e+00> : vector<8x128xf32>
    %3 = tpu.matmul %1, %2, %cst {dimension_numbers = #tpu.dot_dimension_numbers<[1], [0], [0], [1], [0, 0, 1, 1], [], []>} : vector<8x128xbf16>, vector<128x128xbf16>, vector<8x128xf32> -> vector<8x128xf32>
    %c0_3 = arith.constant 0 : index
    %c0_4 = arith.constant 0 : index
    %4 = vector.load %arg4[%c0_3, %c0_4] : memref<1x128xf32, #tpu.memory_space<vmem>>, vector<1x128xf32>
    %5 = vector.broadcast %4 : vector<1x128xf32> to vector<8x128xf32>
    %6 = arith.addf %3, %5 : vector<8x128xf32>
    %c0_5 = arith.constant 0 : index
    %c0_6 = arith.constant 0 : index
    %7 = vector.load %arg2[%c0_5, %c0_6] : memref<8x128xf32, #tpu.memory_space<vmem>>, vector<8x128xf32>
    %8 = arith.addf %6, %7 : vector<8x128xf32>
    %9 = math.tanh %8 : vector<8x128xf32>
    %10 = arith.truncf %9 : vector<8x128xf32> to vector<8x128xbf16>
    %c0_7 = arith.constant 0 : index
    %c0_8 = arith.constant 0 : index
    %11 = vector.load %arg5[%c0_7, %c0_8] : memref<128x128xbf16, #tpu.memory_space<vmem>>, vector<128x128xbf16>
    %cst_9 = arith.constant dense<0.000000e+00> : vector<8x128xf32>
    %12 = tpu.matmul %10, %11, %cst_9 {dimension_numbers = #tpu.dot_dimension_numbers<[1], [0], [0], [1], [0, 0, 1, 1], [], []>} : vector<8x128xbf16>, vector<128x128xbf16>, vector<8x128xf32> -> vector<8x128xf32>
    %c0_10 = arith.constant 0 : index
    %c0_11 = arith.constant 0 : index
    %13 = vector.load %arg6[%c0_10, %c0_11] : memref<1x128xf32, #tpu.memory_space<vmem>>, vector<1x128xf32>
    %14 = vector.broadcast %13 : vector<1x128xf32> to vector<8x128xf32>
    %15 = arith.addf %12, %14 : vector<8x128xf32>
    %cst_12 = arith.constant 5.000000e-01 : f32
    %16 = vector.broadcast %cst_12 : f32 to vector<8x128xf32>
    %17 = arith.mulf %16, %15 : vector<8x128xf32>
    %cst_13 = arith.constant 2.000000e+00 : f32
    %18 = math.sqrt %cst_13 : f32
    %cst_14 = arith.constant 1.000000e+00 : f32
    %19 = arith.divf %cst_14, %18 : f32
    %20 = vector.broadcast %19 : f32 to vector<8x128xf32>
    %21 = arith.mulf %15, %20 : vector<8x128xf32>
    %22 = math.erf %21 : vector<8x128xf32>
    %cst_15 = arith.constant 1.000000e+00 : f32
    %23 = vector.broadcast %cst_15 : f32 to vector<8x128xf32>
    %24 = arith.addf %23, %22 : vector<8x128xf32>
    %25 = arith.mulf %17, %24 : vector<8x128xf32>
    %c0_16 = arith.constant 0 : index
    %c0_17 = arith.constant 0 : index
    %26 = vector.load %arg7[%c0_16, %c0_17] : memref<1x128xf32, #tpu.memory_space<vmem>>, vector<1x128xf32>
    %27 = vector.broadcast %26 : vector<1x128xf32> to vector<8x128xf32>
    %28 = arith.mulf %25, %27 : vector<8x128xf32>
    %cst_18 = arith.constant dense<0.000000e+00> : vector<8xf32>
    %29 = vector.multi_reduction <add>, %28, %cst_18 [1] : vector<8x128xf32> to vector<8xf32>
    %30 = vector.shape_cast %29 : vector<8xf32> to vector<8x1xf32>
    %c0_19 = arith.constant 0 : index
    %c0_20 = arith.constant 0 : index
    %31 = memref.load %arg8[%c0_19, %c0_20] : memref<1x1xf32, #tpu.memory_space<smem>>
    %32 = vector.broadcast %31 : f32 to vector<8x1xf32>
    %33 = arith.addf %30, %32 : vector<8x1xf32>
    %cst_21 = arith.constant 0.333333343 : f32
    %34 = vector.broadcast %cst_21 : f32 to vector<8x1xf32>
    %35 = arith.mulf %33, %34 : vector<8x1xf32>
    %36 = math.tanh %35 : vector<8x1xf32>
    %cst_22 = arith.constant 3.000000e+00 : f32
    %37 = vector.broadcast %cst_22 : f32 to vector<8x1xf32>
    %38 = arith.mulf %37, %36 : vector<8x1xf32>
    %39 = vector.shape_cast %38 : vector<8x1xf32> to vector<8x1xf32>
    %40 = vector.broadcast %39 : vector<8x1xf32> to vector<8x128xf32>
    %c0_23 = arith.constant 0 : index
    %c0_24 = arith.constant 0 : index
    %41 = vector.load %arg9[%c0_23, %c0_24] : memref<8x128xf32, #tpu.memory_space<vmem>>, vector<8x128xf32>
    tpu.vector_store %arg9[%c0_23, %c0_24], %40 {strides = array<i32>} : memref<8x128xf32, #tpu.memory_space<vmem>>, vector<8x128xf32>,
    return
  }
  func.func @transform_0(%arg0: i32) -> (i32, i32) {
    %c0_i32 = arith.constant 0 : i32
    %c0_i32_0 = arith.constant 0 : i32
    return %arg0, %c0_i32 : i32, i32
  }
  func.func @transform_1(%arg0: i32) -> (i32, i32) {
    %c0_i32 = arith.constant 0 : i32
    %c0_i32_0 = arith.constant 0 : i32
    return %arg0, %c0_i32 : i32, i32
  }
  func.func @transform_2(%arg0: i32) -> (i32, i32) {
    %c0_i32 = arith.constant 0 : i32
    %c0_i32_0 = arith.constant 0 : i32
    %c0_i32_1 = arith.constant 0 : i32
    return %c0_i32, %c0_i32_0 : i32, i32
  }
  func.func @transform_3(%arg0: i32) -> (i32, i32) {
    %c0_i32 = arith.constant 0 : i32
    %c0_i32_0 = arith.constant 0 : i32
    %c0_i32_1 = arith.constant 0 : i32
    return %c0_i32, %c0_i32_0 : i32, i32
  }
  func.func @transform_4(%arg0: i32) -> (i32, i32) {
    %c0_i32 = arith.constant 0 : i32
    %c0_i32_0 = arith.constant 0 : i32
    %c0_i32_1 = arith.constant 0 : i32
    return %c0_i32, %c0_i32_0 : i32, i32
  }
  func.func @transform_5(%arg0: i32) -> (i32, i32) {
    %c0_i32 = arith.constant 0 : i32
    %c0_i32_0 = arith.constant 0 : i32
    %c0_i32_1 = arith.constant 0 : i32
    return %c0_i32, %c0_i32_0 : i32, i32
  }
  func.func @transform_6(%arg0: i32) -> (i32, i32) {
    %c0_i32 = arith.constant 0 : i32
    %c0_i32_0 = arith.constant 0 : i32
    %c0_i32_1 = arith.constant 0 : i32
    return %c0_i32, %c0_i32_0 : i32, i32
  }
  func.func @transform_7(%arg0: i32) -> (i32, i32) {
    %c0_i32 = arith.constant 0 : i32
    %c0_i32_0 = arith.constant 0 : i32
    %c0_i32_1 = arith.constant 0 : i32
    return %c0_i32, %c0_i32_0 : i32, i32
  }
  func.func @transform_8(%arg0: i32) -> (i32, i32) {
    %c0_i32 = arith.constant 0 : i32
    %c0_i32_0 = arith.constant 0 : i32
    return %arg0, %c0_i32 : i32, i32
  }
}

</mosaic_0001>

<bundles_post_ra>
// kernel: cot_aware_reward_model_forward.1
= control target key start
LH: loop header
LB: loop body
LE: loop exit
PB: predicated region body
PF: predicated region fallthrough
CT: control target
= control target key end

     0   :  { %v386_v0 = vmov 0.0   ;;  %vm387_vm0 = vmmov 0   ;;  %s502_s2 = inlined_call_operand.vmem [shape: bf16[128,128], index: 2, kind: input, shape index: {}]   ;;  %s503_s4 = inlined_call_operand.vmem [shape: bf16[128,128], index: 4, kind: input, shape index: {}]   ;;  %s504_s0 = inlined_call_operand.vmem [shape: f32[8,128], index: 0, kind: input, shape index: {}]   ;;  %s505_s3 = inlined_call_operand.vmem [shape: f32[1,128], index: 3, kind: input, shape index: {}]   ;;  %s506_s1 = inlined_call_operand.vmem [shape: f32[8,128], index: 1, kind: input, shape index: {}]   ;;  %s507_s5 = inlined_call_operand.vmem [shape: f32[1,128], index: 5, kind: input, shape index: {}]   ;;  %s508_s6 = inlined_call_operand.vmem [shape: f32[1,128], index: 6, kind: input, shape index: {}]   ;;  %s509_s7 = inlined_call_operand.<no memory space> [shape: f32[1,1], index: 7, kind: input, shape index: {}]   ;;  %s510_s8 = inlined_call_operand.vmem [shape: f32[8,128], index: 8, kind: output, shape index: {}]  }
   0x1   :  { %322 = vmatprep.subr.bf16.mxu0 %v386_v0  ;;  %v364_v1 = vld [vmem:[%s502_s2 + $0x38] sm:$0xff]   ;;  %338 = vmatprep.mubr.msk.bf16.mxu0 %vm387_vm0, %v386_v0  ;;  %v365_v2 = vld [vmem:[%s502_s2 + $0x30] sm:$0xff]   ;;  %v366_v3 = vld [vmem:[%s502_s2 + $0x28] sm:$0xff]   ;;  %v275_v42 = vstv %s509_s7 }
   0x2   :  { %342 = vmatprep.subr.bf16.mxu1 %v386_v0  ;;  %358 = vmatprep.mubr.msk.bf16.mxu1 %vm387_vm0, %v386_v0  ;;  %v372_v4 = vld [vmem:[%s503_s4 + $0x38] sm:$0xff]   ;;  %v367_v5 = vld [vmem:[%s502_s2 + $0x20] sm:$0xff]   ;;  %v373_v6 = vld [vmem:[%s503_s4 + $0x30] sm:$0xff]  }
   0x3   :  { %323 = vmatpush3.bf16.msra.mxu0 %v364_v1  ;;  %343 = vmatpush3.bf16.msra.mxu1 %v372_v4  ;;  %v368_v7 = vld [vmem:[%s502_s2 + $0x18] sm:$0xff]   ;;  %v374_v8 = vld [vmem:[%s503_s4 + $0x28] sm:$0xff]   ;;  %v369_v9 = vld [vmem:[%s502_s2 + $0x10] sm:$0xff]  }
   0x4   :  { %324 = vmatprep.subr.bf16.mxu0 %v386_v0  ;;  %344 = vmatprep.subr.bf16.mxu1 %v386_v0  ;;  %v370_v10 = vld [vmem:[%s502_s2 + $0x8] sm:$0xff]   ;;  %v371_v11 = vld [vmem:[%s502_s2] sm:$0xff]   ;;  %v376_v15 = vld [vmem:[%s503_s4 + $0x18] sm:$0xff]  }
   0x5   :  { %v31_v12 = vld [vmem:[%s504_s0] sm:$0xff]  ;;  %v377_v16 = vld [vmem:[%s503_s4 + $0x10] sm:$0xff]   ;;  %v378_v17 = vld [vmem:[%s503_s4 + $0x8] sm:$0xff]  }
   0x6   :  { %v32_v13 = vpack.c.bf16 %v31_v12, %v31_v12  ;;  %v375_v14 = vld [vmem:[%s503_s4 + $0x20] sm:$0xff]  }
   0x7   :  { %325 = vmatpush3.bf16.msra.mxu0 %v365_v2  ;;  %345 = vmatpush3.bf16.msra.mxu1 %v373_v6  ;;  %v379_v18 = vld [vmem:[%s503_s4] sm:$0xff]  }
   0x8   :  { %326 = vmatprep.subr.bf16.mxu0 %v386_v0  ;;  %346 = vmatprep.subr.bf16.mxu1 %v386_v0  ;;  %v285_v19 = vld [vmem:[%s505_s3] ss:$0 sm:$0xff] }
   0x9   :  { %v144_v21 = vld [vmem:[%s506_s1] sm:$0xff] }
   0xa   :  { %v294_v29 = vld [vmem:[%s507_s5] ss:$0 sm:$0xff] }
   0xb   :  { %327 = vmatpush3.bf16.msra.mxu0 %v366_v3  ;;  %347 = vmatpush3.bf16.msra.mxu1 %v374_v8  ;;  %v303_v39 = vld [vmem:[%s508_s6] ss:$0 sm:$0xff] }
   0xc   :  { %328 = vmatprep.subr.bf16.mxu0 %v386_v0  ;;  %348 = vmatprep.subr.bf16.mxu1 %v386_v0 }
   0xf   :  { %329 = vmatpush3.bf16.msra.mxu0 %v367_v5  ;;  %349 = vmatpush3.bf16.msra.mxu1 %v375_v14 }
  0x10   :  { %330 = vmatprep.subr.bf16.mxu0 %v386_v0  ;;  %350 = vmatprep.subr.bf16.mxu1 %v386_v0 }
  0x13   :  { %331 = vmatpush3.bf16.msra.mxu0 %v368_v7  ;;  %351 = vmatpush3.bf16.msra.mxu1 %v376_v15 }
  0x14   :  { %332 = vmatprep.subr.bf16.mxu0 %v386_v0  ;;  %352 = vmatprep.subr.bf16.mxu1 %v386_v0 }
  0x17   :  { %333 = vmatpush3.bf16.msra.mxu0 %v369_v9  ;;  %353 = vmatpush3.bf16.msra.mxu1 %v377_v16 }
  0x18   :  { %334 = vmatprep.subr.bf16.mxu0 %v386_v0  ;;  %354 = vmatprep.subr.bf16.mxu1 %v386_v0 }
  0x1b   :  { %335 = vmatpush3.bf16.msra.mxu0 %v370_v10  ;;  %355 = vmatpush3.bf16.msra.mxu1 %v378_v17 }
  0x1c   :  { %336 = vmatprep.subr.bf16.mxu0 %v386_v0  ;;  %356 = vmatprep.subr.bf16.mxu1 %v386_v0 }
  0x1f   :  { %337 = vmatpush3.bf16.msra.mxu0 %v371_v11  ;;  %357 = vmatpush3.bf16.msra.mxu1 %v379_v18 }
  0x22   :  { %339 = vmatmul.mubr.bf16.vlgmr.msra.gmra.mxu0 %v32_v13 }
  0xe2   :  { %v138_v20 = vpop.f32.mrf.mxu0 }
  0xe3   :  { %v139_v22 = vadd.f32 %v285_v19, %v138_v20 }
  0xe4   :  { %v340_v23 = vpop.f32.mrf.mxu0 }
  0xe5   :  { %v145_v24 = vadd.f32 %v144_v21, %v139_v22 }
  0xe6   :  { %v141_v25 = vpop.f32.mrf.mxu0 }
  0xe7   :  { %380 = vtanh.f32 %v145_v24 }
  0xe8   :  { %v341_v26 = vpop.f32.mrf.mxu0 }
  0xf4   :  { %v381_v27 = vpop.eup %380 }
  0xf5   :  { %v147_v28 = vpack.c.bf16 %v381_v27, %v381_v27 }
  0xf7   :  { %359 = vmatmul.mubr.bf16.vlgmr.msra.gmra.mxu1 %v147_v28 }
 0x1b7   :  { %v253_v30 = vpop.f32.mrf.mxu1 }
 0x1b8   :  { %v254_v31 = vadd.f32 %v294_v29, %v253_v30 }
 0x1b9   :  { %v360_v32 = vpop.f32.mrf.mxu1 }
 0x1ba   :  { %v260_v33 = vmul.f32 0.70710677, %v254_v31  ;;  %v259_v37 = vmul.f32 0.5, %v254_v31 }
 0x1bb   :  { %v256_v34 = vpop.f32.mrf.mxu1 }
 0x1bc   :  { %382 = verf.f32 %v260_v33 }
 0x1bd   :  { %v361_v35 = vpop.f32.mrf.mxu1 }
 0x1c9   :  { %v383_v36 = vpop.eup %382 }
 0x1ca   :  { %v262_v38 = vadd.f32 1.0, %v383_v36 }
 0x1cc   :  { %v263_v40 = vmul.f32 %v262_v38, %v259_v37 }
 0x1ce   :  { %v271_v41 = vmul.f32 %v303_v39, %v263_v40 }
 0x1d0   :  { %272 = vadd.xlane.f32.xlu0 %v271_v41 }
 0x259   :  { %v273_v43 = vpop.xlane.xlu0 %272 }
 0x25a   :  { %v276_v44 = vadd.f32 %v275_v42, %v273_v43 }
 0x25c   :  { %v277_v45 = vmul.f32 0.33333334, %v276_v44 }
 0x25e   :  { %384 = vtanh.f32 %v277_v45 }
 0x26b   :  { %v385_v46 = vpop.eup %384 }
 0x26c   :  { %v279_v47 = vmul.f32 3.0, %v385_v46 }
 0x26e   :  { %280 = vst [vmem:[%s510_s8] sm:$0xff] %v279_v47 }

</bundles_post_ra>
